<compile_context>
chip_gen: v7x
topology: tpu7x:2x2x1
jax: 0.10.0
libtpu: 0.0.40
codegen_flags: <defaults>
</compile_context>

<pallas_src>
import functools

import jax
import jax.numpy as jnp
from jax.experimental import pallas as pl
from jax.experimental.pallas import tpu as pltpu


def _identity_dma_kernel(x_hbm, o_hbm, sems, *, chunk_bounds):
    """Copy x -> o with len(chunk_bounds) concurrent contiguous HBM->HBM DMAs."""
    copies = []
    # Start ALL copies first ...
    for i, (start, size) in enumerate(chunk_bounds):
        cp = pltpu.make_async_copy(
            x_hbm.at[pl.ds(start, size)],
            o_hbm.at[pl.ds(start, size)],
            sems.at[i],
        )
        cp.start()
        copies.append(cp)
    # ... then wait on all of them, so the DMAs overlap each other.
    for cp in copies:
        cp.wait()


def _default_num_chunks(nbytes):
    # Modest chunk counts: concurrency helps hide descriptor latency on big
    # copies (esp. v7x), but extra descriptors are pure overhead on small ones
    # and on v5e (~820 GB/s, already near roofline with 1-2 streams).
    if nbytes <= (4 << 20):
        return 1
    if nbytes <= (64 << 20):
        return 2
    return 4


def _chunk_bounds(leading_dim, num_chunks):
    """Static (start, size) slabs covering [0, leading_dim) along axis 0."""
    num_chunks = max(1, min(num_chunks, leading_dim))
    base, rem = divmod(leading_dim, num_chunks)
    bounds = []
    start = 0
    for i in range(num_chunks):
        size = base + (1 if i < rem else 0)
        bounds.append((start, size))
        start += size
    return tuple(bounds)


def identity_pallas(x, *, copy=True, num_chunks=None,
                    small_input_threshold_bytes=1 << 20):
    """Identity forward pass (y == x).

    Args:
      x: any-shape, any-dtype array.
      copy: if False, return ``x`` unchanged (zero-cost, exact nn.Identity
        semantics).  If True (default), return a fresh output buffer.
      num_chunks: number of concurrent contiguous DMA slabs along the leading
        axis.  None -> size-based heuristic.
      small_input_threshold_bytes: inputs smaller than this skip the Pallas
        kernel and use jnp.copy (kernel-launch overhead would dominate).
        Set to 0 to force the kernel path.
    """
    x = jnp.asarray(x)

    if not copy:
        return x  # true nn.Identity: no copy at all.

    nbytes = x.size * x.dtype.itemsize

    # Degenerate / tiny inputs: a fresh buffer via XLA's copy is cheaper than
    # launching a kernel.  Still honors the copy=True "fresh buffer" contract.
    if x.ndim == 0 or x.size == 0 or nbytes < small_input_threshold_bytes:
        return jnp.copy(x)

    if num_chunks is None:
        num_chunks = _default_num_chunks(nbytes)
    chunk_bounds = _chunk_bounds(x.shape[0], num_chunks)
    n = len(chunk_bounds)

    kernel = functools.partial(_identity_dma_kernel, chunk_bounds=chunk_bounds)

    return pl.pallas_call(
        kernel,
        out_shape=jax.ShapeDtypeStruct(x.shape, x.dtype),
        in_specs=[pl.BlockSpec(memory_space=pl.ANY)],
        out_specs=pl.BlockSpec(memory_space=pl.ANY),
        scratch_shapes=[pltpu.SemaphoreType.DMA((n,))],
        cost_estimate=pl.CostEstimate(
            flops=0, transcendentals=0, bytes_accessed=2 * nbytes),
    )(x)


if __name__ == "__main__":
    key = jax.random.PRNGKey(0)

    # Small NCHW-style input consistent with Identity used as a pass-through
    # layer on conv-style activations.
    x = jax.random.normal(key, (2, 4, 16, 16), dtype=jnp.float32)

    # Force the Pallas kernel path (the input is below the small-input
    # fallback threshold) so the kernel actually compiles and runs on TPU.
    y = identity_pallas(x, small_input_threshold_bytes=0)
    y = jax.block_until_ready(y)
    assert y.shape == x.shape, (y.shape, x.shape)
    assert y.dtype == x.dtype, (y.dtype, x.dtype)
    assert jnp.array_equal(y, x), "Identity output mismatch (kernel path)"

    # Exercise the multi-chunk concurrent-DMA path on a slightly larger input.
    x2 = jax.random.normal(key, (8, 128, 128), dtype=jnp.float32)  # 512 KiB
    y2 = identity_pallas(x2, num_chunks=4, small_input_threshold_bytes=0)
    y2 = jax.block_until_ready(y2)
    assert jnp.array_equal(y2, x2), "Identity output mismatch (chunked path)"

    # Default small-input fallback (jnp.copy) and zero-copy fast path.
    y3 = jax.block_until_ready(identity_pallas(x))          # fallback path
    assert jnp.array_equal(y3, x)
    y4 = identity_pallas(x, copy=False)                     # alias path
    assert y4.shape == x.shape and jnp.array_equal(y4, x)

    # Degenerate inputs with copy=True still return fresh buffers.
    s = jnp.float32(3.0)
    assert jnp.array_equal(identity_pallas(s), s)
    z = jnp.zeros((0, 8), jnp.bfloat16)
    assert identity_pallas(z).shape == z.shape

    print("KERNEL_OK")
</pallas_src>

<mosaic_0001>
module attributes {stable_mosaic.version = 11 : i64} {
  func.func @_identity_dma_kernel(%arg0: memref<2x4x16x16xf32, #tpu.memory_space<any>>, %arg1: memref<2x4x16x16xf32, #tpu.memory_space<any>>, %arg2: memref<1x!tpu.dma_semaphore, #tpu.memory_space<semaphore_mem>>) attributes {dimension_semantics = [], scalar_prefetch = 0 : i64, scratch_operands = 1 : i64, tpu.core_type = #tpu.core_type<tc>} {
    %c0_i32 = arith.constant 0 : i32
    %c0_i32_0 = arith.constant 0 : i32
    %c0_i32_1 = arith.constant 0 : i32
    %c0_i32_2 = arith.constant 0 : i32
    %c0_i32_3 = arith.constant 0 : i32
    %0 = tpu.memref_slice %arg0[%c0_i32_0, %c0_i32_1, %c0_i32_2, %c0_i32_3] : memref<2x4x16x16xf32, #tpu.memory_space<any>> -> memref<2x4x16x16xf32, #tpu.memory_space<any>>
    %c0_i32_4 = arith.constant 0 : i32
    %c0_i32_5 = arith.constant 0 : i32
    %c0_i32_6 = arith.constant 0 : i32
    %c0_i32_7 = arith.constant 0 : i32
    %1 = tpu.memref_slice %arg1[%c0_i32_4, %c0_i32_5, %c0_i32_6, %c0_i32_7] : memref<2x4x16x16xf32, #tpu.memory_space<any>> -> memref<2x4x16x16xf32, #tpu.memory_space<any>>
    %2 = tpu.memref_slice %arg2[%c0_i32] : memref<1x!tpu.dma_semaphore, #tpu.memory_space<semaphore_mem>> -> memref<1x!tpu.dma_semaphore, #tpu.memory_space<semaphore_mem>>
    %3 = tpu.memref_squeeze %2 : memref<1x!tpu.dma_semaphore, #tpu.memory_space<semaphore_mem>> -> memref<!tpu.dma_semaphore, #tpu.memory_space<semaphore_mem>>
    tpu.enqueue_dma source(%0 : memref<2x4x16x16xf32, #tpu.memory_space<any>>) target(%1 : memref<2x4x16x16xf32, #tpu.memory_space<any>>) target_semaphore(%3 : memref<!tpu.dma_semaphore, #tpu.memory_space<semaphore_mem>>)
    %c0_i32_8 = arith.constant 0 : i32
    %c0_i32_9 = arith.constant 0 : i32
    %c0_i32_10 = arith.constant 0 : i32
    %c0_i32_11 = arith.constant 0 : i32
    %c0_i32_12 = arith.constant 0 : i32
    %4 = tpu.memref_slice %arg0[%c0_i32_9, %c0_i32_10, %c0_i32_11, %c0_i32_12] : memref<2x4x16x16xf32, #tpu.memory_space<any>> -> memref<2x4x16x16xf32, #tpu.memory_space<any>>
    %c0_i32_13 = arith.constant 0 : i32
    %c0_i32_14 = arith.constant 0 : i32
    %c0_i32_15 = arith.constant 0 : i32
    %c0_i32_16 = arith.constant 0 : i32
    %5 = tpu.memref_slice %arg1[%c0_i32_13, %c0_i32_14, %c0_i32_15, %c0_i32_16] : memref<2x4x16x16xf32, #tpu.memory_space<any>> -> memref<2x4x16x16xf32, #tpu.memory_space<any>>
    %6 = tpu.memref_slice %arg2[%c0_i32_8] : memref<1x!tpu.dma_semaphore, #tpu.memory_space<semaphore_mem>> -> memref<1x!tpu.dma_semaphore, #tpu.memory_space<semaphore_mem>>
    %7 = tpu.memref_squeeze %6 : memref<1x!tpu.dma_semaphore, #tpu.memory_space<semaphore_mem>> -> memref<!tpu.dma_semaphore, #tpu.memory_space<semaphore_mem>>
    tpu.wait_dma2 semaphore(%7 : memref<!tpu.dma_semaphore, #tpu.memory_space<semaphore_mem>>) src(%4 : memref<2x4x16x16xf32, #tpu.memory_space<any>>) dst(%5 : memref<2x4x16x16xf32, #tpu.memory_space<any>>)
    return
  }
}

</mosaic_0001>

<bundles_post_ra>
// kernel: tpu_custom_call.1
= control target key start
LH: loop header
LB: loop body
LE: loop exit
PB: predicated region body
PF: predicated region fallthrough
CT: control target
= control target key end

     0   :  { %s36_s6 = smov [#allocation2]   ;;  %s37_s7 = smov [#allocation3]   ;;  %s55_s0 = inlined_call_operand.hbm [shape: f32[2,4,16,16], index: 0, kind: input, shape index: {}]   ;;  %s56_s1 = inlined_call_operand.hbm [shape: f32[2,4,16,16], index: 1, kind: output, shape index: {}]  }
   0x1   :  { %s38_s8 = smov 0  }
   0x2   :  { %18 = dma.general %s55_s0, 2048, %s56_s1, %s36_s6, %s37_s7, [#allocation4], %s38_s8, 0  }
   0x3   :  { %34 = dma.done.wait [#allocation2], 2048 }
   0x4   :  { %35 = vsyncadd [#allocation2], 4294965248 }
   0x5   :  { %24 = vsyncmov [#allocation2] }
   0x8   :  { %s25_s13 = vpop.sfrf %24 }
   0x9   :  { %p30_p0 = scmp.ne.s32.totalorder %s25_s13, 0 }
   0xb   :  { %29 = shalt.err (%p30_p0)  }

</bundles_post_ra>
